<compile_context>
chip_gen: v6e
topology: v6e:2x2x1
jax: 0.10.0
libtpu: 0.0.40
codegen_flags: <defaults>
</compile_context>

<pallas_src>
import functools
from typing import NamedTuple, Tuple

import jax
import jax.numpy as jnp
from jax.experimental import pallas as pl
from jax.experimental.pallas import tpu as pltpu


def _round_up(x, m):
    return ((x + m - 1) // m) * m


class DecoderMeta(NamedTuple):
    num_layers: int
    hidden_dim: int
    embed_dim: int
    output_dim: int
    vocab_pad: int
    emb_off: int
    attn_off: int
    fc_off: int
    lstm_off: Tuple[int, ...]


# ---------------------------------------------------------------------------
# One-time kernel: pack encoder outputs + attention keys (enc @ W_enc + b)
# into a single bf16 (2, B, S, H) array.  Depends only on encoder_outputs,
# so it is computed once before the decode loop.
# ---------------------------------------------------------------------------
def _enc_prep_kernel(enc_ref, wae_ref, ba_ref, out_ref):
    enc = enc_ref[...]                                       # (B, S, H) f32
    B, S, H = enc.shape
    proj = jnp.dot(enc.reshape(B * S, H).astype(jnp.bfloat16), wae_ref[...],
                   preferred_element_type=jnp.float32) + ba_ref[...]
    out_ref[0] = enc.astype(jnp.bfloat16)                    # raw encoder states
    out_ref[1] = proj.reshape(B, S, H).astype(jnp.bfloat16)  # keys (bias folded)


def precompute_attention_keys(encoder_outputs, params):
    """Run once per source sequence, before the decode loop."""
    S, B, H = encoder_outputs.shape
    enc_bsh = jnp.transpose(encoder_outputs, (1, 0, 2))      # (B, S, H)
    wae_t = params["attn_w"][:, H:].T.astype(jnp.bfloat16)   # (H, H) encoder part
    ba = params["attn_b"][None, :]                           # (1, H) f32

    vmem = pl.BlockSpec(memory_space=pltpu.MemorySpace.VMEM)
    enc_pack = pl.pallas_call(
        _enc_prep_kernel,
        out_shape=jax.ShapeDtypeStruct((2, B, S, H), jnp.bfloat16),
        in_specs=[vmem, vmem, vmem],
        out_specs=vmem,
    )(enc_bsh, wae_t, ba)
    return enc_pack


# ---------------------------------------------------------------------------
# One-time weight packing: everything (embedding table, attention, fc_out and
# per-layer LSTM gate blocks) goes into ONE bf16 slab of width >= 128, with
# 8-row-aligned sub-blocks.  Biases are folded into the blocks as extra rows;
# b_ih + b_hh are pre-summed.
# ---------------------------------------------------------------------------
def prepare_decoder_weights(params, hidden_dim, embed_dim):
    H, E = hidden_dim, embed_dim
    V = params["fc_w"].shape[0]
    v_pad = _round_up(V, 128)
    width = max(128, v_pad, 4 * H)

    blocks = []
    offsets = {}
    row = 0

    def add(name, mat):
        nonlocal row
        r, c = mat.shape
        r_pad = _round_up(r, 8)
        blocks.append(jnp.pad(mat, ((0, r_pad - r), (0, width - c))))
        offsets[name] = row
        row += r_pad

    # embedding table (V, E)
    add("emb", params["embedding"])
    # attention: rows [W_attn_hidden^T (H,H) ; v (1,H)]
    add("attn", jnp.concatenate([params["attn_w"][:, :H].T, params["v_w"]], axis=0))
    # fc_out: rows [W_h ; W_weighted ; W_emb ; bias]  (cols = vocab, padded)
    add("fc", jnp.concatenate([params["fc_w"].T, params["fc_b"][None, :]], axis=0))
    # LSTM layer l: rows [w_ih^T (in,4H) ; w_hh^T (H,4H) ; b_ih+b_hh (1,4H)]
    for l, p in enumerate(params["lstm"]):
        b = (p["b_ih"] + p["b_hh"])[None, :]
        add(f"lstm{l}", jnp.concatenate([p["w_ih"].T, p["w_hh"].T, b], axis=0))

    slab = jnp.concatenate(blocks, axis=0).astype(jnp.bfloat16)   # (rows, width)
    meta = DecoderMeta(
        num_layers=len(params["lstm"]),
        hidden_dim=H, embed_dim=E, output_dim=V, vocab_pad=v_pad,
        emb_off=offsets["emb"], attn_off=offsets["attn"], fc_off=offsets["fc"],
        lstm_off=tuple(offsets[f"lstm{l}"] for l in range(len(params["lstm"]))))
    return slab, meta


# ---------------------------------------------------------------------------
# Persistent decode kernel: one grid step == one Decoder.forward step.
# Weights / encoder tensors are VMEM-resident (constant index maps); the
# (hidden, cell) state lives in VMEM scratch across steps.
# ---------------------------------------------------------------------------
def _decode_step_kernel(meta, ids_ref, state_in_ref, enc_ref, w_ref,
                        pred_ref, state_out_ref, state):
    f32, bf16 = jnp.float32, jnp.bfloat16
    L, H, E = meta.num_layers, meta.hidden_dim, meta.embed_dim
    V, Vp = meta.output_dim, meta.vocab_pad
    B = ids_ref.shape[1]

    t = pl.program_id(0)

    @pl.when(t == 0)
    def _init_state():
        state[...] = state_in_ref[...]

    # Snapshot state BEFORE any writes (keeps read/write ordering explicit).
    h_all = state[0]                                        # (L, B, H) f32
    c_all = state[1]                                        # (L, B, H) f32

    # ---- embedding lookup: one-hot @ table on the MXU (in-kernel gather) ----
    ids = ids_ref[t]                                        # (B, 1) int32
    vocab_iota = jax.lax.broadcasted_iota(jnp.int32, (B, V), 1)
    onehot = (vocab_iota == ids).astype(bf16)               # (B, V)
    emb_tbl = w_ref[meta.emb_off:meta.emb_off + V, :E]      # (V, E) bf16
    emb = jnp.dot(onehot, emb_tbl, preferred_element_type=f32)   # (B, E) f32
    # (dropout on embedded tokens is identity at inference)

    # ---- Bahdanau attention: softmax(v . tanh(h@Wh + [enc@We + b])) ---------
    a0 = meta.attn_off
    wah = w_ref[a0:a0 + H, :H]                              # (H, H) bf16
    v_row = w_ref[a0 + H:a0 + H + 1, :H].astype(f32)        # (1, H) f32
    h_top = h_all[L - 1]                                    # (B, H) f32
    hid_proj = jnp.dot(h_top.astype(bf16), wah, preferred_element_type=f32)
    enc = enc_ref[0]                                        # (B, S, H) bf16
    enc_keys = enc_ref[1].astype(f32)                       # (B, S, H) f32
    energy = jnp.tanh(hid_proj[:, None, :] + enc_keys)      # (B, S, H) f32
    # v-dot kept on VPU+XLU (tiny at S=8/H=32); scores: (B, S)
    scores = jnp.sum(energy * v_row, axis=-1)
    m = jnp.max(scores, axis=-1, keepdims=True)
    e = jnp.exp(scores - m)
    probs = e * pl.reciprocal(jnp.sum(e, axis=-1, keepdims=True), approx=True)

    # weighted context on the MXU: (B,1,S) @ (B,S,H) -> (B,H), f32 accumulate
    weighted = jnp.einsum("bqs,bsh->bqh", probs[:, None, :].astype(bf16), enc,
                          preferred_element_type=f32)[:, 0, :]

    # ---- stacked LSTM: one lane-dense (B, 4H) pre-activation per layer ------
    x = None
    for layer in range(L):
        w0 = meta.lstm_off[layer]
        h_prev = h_all[layer]                               # (B, H)
        c_prev = c_all[layer]                               # (B, H)
        if layer == 0:
            parts = [(emb, 0, E), (weighted, E, H), (h_prev, E + H, H)]
        else:
            parts = [(x, 0, H), (h_prev, H, H)]

        acc = None
        for act, roff, rows in parts:
            w = w_ref[w0 + roff:w0 + roff + rows, :4 * H]   # bf16 (rows, 4H)
            part = jnp.dot(act.astype(bf16), w, preferred_element_type=f32)
            acc = part if acc is None else acc + part
        b_off = parts[-1][1] + parts[-1][2]
        gates = acc + w_ref[w0 + b_off:w0 + b_off + 1, :4 * H].astype(f32)

        # gate order i, f, g, o (PyTorch); slices of one 128-lane result
        i_g = jax.nn.sigmoid(gates[:, 0:H])
        f_g = jax.nn.sigmoid(gates[:, H:2 * H])
        g_g = jnp.tanh(gates[:, 2 * H:3 * H])
        o_g = jax.nn.sigmoid(gates[:, 3 * H:4 * H])

        c_new = f_g * c_prev + i_g * g_g
        h_new = o_g * jnp.tanh(c_new)

        state[0, layer, :, :] = h_new
        state[1, layer, :, :] = c_new
        x = h_new   # inter-layer LSTM dropout is identity at inference

    # ---- fc_out(cat(output, weighted, embedded)): three split matmuls -------
    f0 = meta.fc_off
    logits = (jnp.dot(x.astype(bf16), w_ref[f0:f0 + H, :Vp],
                      preferred_element_type=f32)
              + jnp.dot(weighted.astype(bf16), w_ref[f0 + H:f0 + 2 * H, :Vp],
                        preferred_element_type=f32)
              + jnp.dot(emb.astype(bf16), w_ref[f0 + 2 * H:f0 + 2 * H + E, :Vp],
                        preferred_element_type=f32)
              + w_ref[f0 + 2 * H + E:f0 + 2 * H + E + 1, :Vp].astype(f32))
    pred_ref[0] = logits                                    # lane-dense store

    # write the final (hidden, cell) back to HBM once, at the last step
    @pl.when(t == pl.num_programs(0) - 1)
    def _flush_state():
        state_out_ref[...] = state[...]


# ---------------------------------------------------------------------------
# Wrappers
# ---------------------------------------------------------------------------
def _decode_loop_impl(ids, hidden, cell, enc_pack, slab, *, meta):
    """Run T decoder steps in one persistent kernel.  ids: (T, B) int32."""
    T, B = ids.shape
    L, H = hidden.shape[0], hidden.shape[2]
    Vp = meta.vocab_pad

    state_in = jnp.stack([hidden, cell])                    # (2, L, B, H) f32
    ids3 = ids.reshape(T, B, 1).astype(jnp.int32)           # (T, B, 1)

    kernel = functools.partial(_decode_step_kernel, meta)

    in_specs = [
        pl.BlockSpec((T, B, 1), lambda t: (0, 0, 0)),            # token ids
        pl.BlockSpec((2, L, B, H), lambda t: (0, 0, 0, 0)),      # initial state
        pl.BlockSpec(enc_pack.shape, lambda t: (0, 0, 0, 0)),    # enc + keys
        pl.BlockSpec(slab.shape, lambda t: (0, 0)),              # weight slab
    ]
    out_specs = (
        pl.BlockSpec((1, B, Vp), lambda t: (t, 0, 0)),           # per-step logits
        pl.BlockSpec((2, L, B, H), lambda t: (0, 0, 0, 0)),      # final state
    )
    out_shape = (
        jax.ShapeDtypeStruct((T, B, Vp), jnp.float32),
        jax.ShapeDtypeStruct((2, L, B, H), jnp.float32),
    )

    pred_pad, state_out = pl.pallas_call(
        kernel,
        grid=(T,),
        in_specs=in_specs,
        out_specs=out_specs,
        out_shape=out_shape,
        scratch_shapes=[pltpu.VMEM((2, L, B, H), jnp.float32)],
        input_output_aliases={1: 1},     # state_in -> state_out (in place)
        compiler_params=pltpu.CompilerParams(
            dimension_semantics=("arbitrary",)),
    )(ids3, state_in, enc_pack, slab)

    preds = pred_pad[:, :, :meta.output_dim]
    return preds, state_out[0], state_out[1]


decode_loop = jax.jit(_decode_loop_impl, static_argnames=("meta",))


def decoder_forward(input_ids, hidden, cell, enc_pack, slab, meta):
    """Single decode step — mirrors Decoder.forward.  input_ids: (1, B)."""
    preds, h_new, c_new = decode_loop(input_ids, hidden, cell, enc_pack, slab,
                                      meta=meta)
    return preds[0], h_new, c_new


# ---------------------------------------------------------------------------
# Pure-JAX reference (mirrors the PyTorch forward exactly) for verification
# ---------------------------------------------------------------------------
def decoder_reference(input_ids, hidden, cell, encoder_outputs, params):
    L, B, H = hidden.shape
    emb = params["embedding"][input_ids[0]]
    enc = jnp.transpose(encoder_outputs, (1, 0, 2))
    S = enc.shape[1]

    hid_rep = jnp.repeat(hidden[-1][:, None, :], S, axis=1)
    cat = jnp.concatenate([hid_rep, enc], axis=2)
    energy = jnp.tanh(cat @ params["attn_w"].T + params["attn_b"])
    scores = (energy @ params["v_w"].T)[..., 0]
    a = jax.nn.softmax(scores, axis=1)
    weighted = jnp.einsum("bs,bsh->bh", a, enc)

    x = jnp.concatenate([emb, weighted], axis=1)
    h_out, c_out = [], []
    for l in range(L):
        p = params["lstm"][l]
        gates = x @ p["w_ih"].T + p["b_ih"] + hidden[l] @ p["w_hh"].T + p["b_hh"]
        i, f, g, o = jnp.split(gates, 4, axis=1)
        i, f, o = jax.nn.sigmoid(i), jax.nn.sigmoid(f), jax.nn.sigmoid(o)
        g = jnp.tanh(g)
        c = f * cell[l] + i * g
        h = o * jnp.tanh(c)
        h_out.append(h)
        c_out.append(c)
        x = h

    z = jnp.concatenate([x, weighted, emb], axis=1)
    pred = z @ params["fc_w"].T + params["fc_b"]
    return pred, jnp.stack(h_out), jnp.stack(c_out)


# ---------------------------------------------------------------------------
# Deterministic parameter init (synthetic weights, shapes from __init__)
# ---------------------------------------------------------------------------
def init_params(key, output_dim, embed_dim, hidden_dim, num_layers):
    ks = jax.random.split(key, 8)

    def rnd(k, shape, scale=0.1):
        return jax.random.normal(k, shape, dtype=jnp.float32) * scale

    params = {
        "embedding": rnd(ks[0], (output_dim, embed_dim)),
        "attn_w": rnd(ks[1], (hidden_dim, 2 * hidden_dim)),   # nn.Linear(2H, H)
        "attn_b": rnd(ks[2], (hidden_dim,)),
        "v_w": rnd(ks[3], (1, hidden_dim)),                   # nn.Linear(H, 1, bias=False)
        "fc_w": rnd(ks[4], (output_dim, 2 * hidden_dim + embed_dim)),
        "fc_b": rnd(ks[5], (output_dim,)),
        "lstm": [],
    }
    kk = jax.random.split(ks[6], num_layers * 4)
    for l in range(num_layers):
        in_dim = embed_dim + hidden_dim if l == 0 else hidden_dim
        params["lstm"].append({
            "w_ih": rnd(kk[4 * l + 0], (4 * hidden_dim, in_dim)),
            "w_hh": rnd(kk[4 * l + 1], (4 * hidden_dim, hidden_dim)),
            "b_ih": rnd(kk[4 * l + 2], (4 * hidden_dim,)),
            "b_hh": rnd(kk[4 * l + 3], (4 * hidden_dim,)),
        })
    return params


if __name__ == "__main__":
    OUTPUT_DIM, EMBED_DIM, HIDDEN_DIM, NUM_LAYERS = 24, 16, 32, 2
    BATCH, SRC_LEN, T_STEPS = 2, 8, 4

    key = jax.random.PRNGKey(0)
    k_par, k_in, k_h, k_c, k_enc = jax.random.split(key, 5)

    params = init_params(k_par, OUTPUT_DIM, EMBED_DIM, HIDDEN_DIM, NUM_LAYERS)

    input_ids = jax.random.randint(k_in, (T_STEPS, BATCH), 0, OUTPUT_DIM)   # (T, B)
    hidden = jax.random.normal(k_h, (NUM_LAYERS, BATCH, HIDDEN_DIM), jnp.float32)
    cell = jax.random.normal(k_c, (NUM_LAYERS, BATCH, HIDDEN_DIM), jnp.float32)
    encoder_outputs = jax.random.normal(k_enc, (SRC_LEN, BATCH, HIDDEN_DIM),
                                        jnp.float32)

    # one-time prep: packed bf16 weight slab + hoisted encoder projection
    slab, meta = prepare_decoder_weights(params, HIDDEN_DIM, EMBED_DIM)
    enc_pack = precompute_attention_keys(encoder_outputs, params)

    # ---------------- single step (module forward semantics) ----------------
    pred1, h1, c1 = decoder_forward(input_ids[:1], hidden, cell, enc_pack,
                                    slab, meta)
    jax.block_until_ready((pred1, h1, c1))

    pred_r, h_r, c_r = decoder_reference(input_ids[:1], hidden, cell,
                                         encoder_outputs, params)
    assert pred1.shape == (BATCH, OUTPUT_DIM)
    assert h1.shape == (NUM_LAYERS, BATCH, HIDDEN_DIM)
    assert c1.shape == (NUM_LAYERS, BATCH, HIDDEN_DIM)
    # looser tolerance vs the f32 reference: weights/enc carried in bf16
    assert jnp.allclose(pred1, pred_r, atol=5e-2, rtol=5e-2)
    assert jnp.allclose(h1, h_r, atol=5e-2, rtol=5e-2)
    assert jnp.allclose(c1, c_r, atol=5e-2, rtol=5e-2)

    # ------------- fused multi-step decode loop (persistent kernel) ---------
    preds, hT, cT = decode_loop(input_ids, hidden, cell, enc_pack, slab,
                                meta=meta)
    jax.block_until_ready((preds, hT, cT))

    hr, cr = hidden, cell
    ref_preds = []
    for t in range(T_STEPS):
        p_t, hr, cr = decoder_reference(input_ids[t:t + 1], hr, cr,
                                        encoder_outputs, params)
        ref_preds.append(p_t)
    ref_preds = jnp.stack(ref_preds)

    assert preds.shape == (T_STEPS, BATCH, OUTPUT_DIM)
    assert jnp.allclose(preds, ref_preds, atol=6e-2, rtol=6e-2)
    assert jnp.allclose(hT, hr, atol=6e-2, rtol=6e-2)
    assert jnp.allclose(cT, cr, atol=6e-2, rtol=6e-2)

    print("KERNEL_OK")
</pallas_src>

<mosaic_0001>
module attributes {stable_mosaic.version = 11 : i64} {
  func.func @_enc_prep_kernel(%arg0: memref<2x8x32xf32, #tpu.memory_space<vmem>>, %arg1: memref<32x32xbf16, #tpu.memory_space<vmem>>, %arg2: memref<1x32xf32, #tpu.memory_space<vmem>>, %arg3: memref<2x2x8x32xbf16, #tpu.memory_space<vmem>>) attributes {dimension_semantics = [], scalar_prefetch = 0 : i64, scratch_operands = 0 : i64, tpu.core_type = #tpu.core_type<tc>} {
    %c0 = arith.constant 0 : index
    %c0_0 = arith.constant 0 : index
    %c0_1 = arith.constant 0 : index
    %0 = vector.load %arg0[%c0, %c0_0, %c0_1] : memref<2x8x32xf32, #tpu.memory_space<vmem>>, vector<2x8x32xf32>
    %1 = vector.shape_cast %0 : vector<2x8x32xf32> to vector<16x32xf32>
    %2 = arith.truncf %1 : vector<16x32xf32> to vector<16x32xbf16>
    %c0_2 = arith.constant 0 : index
    %c0_3 = arith.constant 0 : index
    %3 = vector.load %arg1[%c0_2, %c0_3] : memref<32x32xbf16, #tpu.memory_space<vmem>>, vector<32x32xbf16>
    %cst = arith.constant dense<0.000000e+00> : vector<16x32xf32>
    %4 = tpu.matmul %2, %3, %cst {dimension_numbers = #tpu.dot_dimension_numbers<[1], [0], [0], [1], [0, 0, 1, 1], [], []>} : vector<16x32xbf16>, vector<32x32xbf16>, vector<16x32xf32> -> vector<16x32xf32>
    %c0_4 = arith.constant 0 : index
    %c0_5 = arith.constant 0 : index
    %5 = vector.load %arg2[%c0_4, %c0_5] : memref<1x32xf32, #tpu.memory_space<vmem>>, vector<1x32xf32>
    %6 = vector.broadcast %5 : vector<1x32xf32> to vector<16x32xf32>
    %7 = arith.addf %4, %6 : vector<16x32xf32>
    %8 = arith.truncf %0 : vector<2x8x32xf32> to vector<2x8x32xbf16>
    %c0_6 = arith.constant 0 : index
    %c0_7 = arith.constant 0 : index
    %c0_8 = arith.constant 0 : index
    %c0_9 = arith.constant 0 : index
    %9 = vector.load %arg3[%c0_6, %c0_7, %c0_8, %c0_9] : memref<2x2x8x32xbf16, #tpu.memory_space<vmem>>, vector<1x2x8x32xbf16>
    %10 = vector.shape_cast %9 : vector<1x2x8x32xbf16> to vector<2x8x32xbf16>
    %11 = vector.shape_cast %8 : vector<2x8x32xbf16> to vector<1x2x8x32xbf16>
    tpu.vector_store %arg3[%c0_6, %c0_7, %c0_8, %c0_9], %11 {strides = array<i32>} : memref<2x2x8x32xbf16, #tpu.memory_space<vmem>>, vector<1x2x8x32xbf16>,
    %12 = vector.shape_cast %7 : vector<16x32xf32> to vector<2x8x32xf32>
    %13 = arith.truncf %12 : vector<2x8x32xf32> to vector<2x8x32xbf16>
    %c1 = arith.constant 1 : index
    %c0_10 = arith.constant 0 : index
    %c0_11 = arith.constant 0 : index
    %c0_12 = arith.constant 0 : index
    %14 = vector.load %arg3[%c1, %c0_10, %c0_11, %c0_12] : memref<2x2x8x32xbf16, #tpu.memory_space<vmem>>, vector<1x2x8x32xbf16>
    %15 = vector.shape_cast %14 : vector<1x2x8x32xbf16> to vector<2x8x32xbf16>
    %16 = vector.shape_cast %13 : vector<2x8x32xbf16> to vector<1x2x8x32xbf16>
    tpu.vector_store %arg3[%c1, %c0_10, %c0_11, %c0_12], %16 {strides = array<i32>} : memref<2x2x8x32xbf16, #tpu.memory_space<vmem>>, vector<1x2x8x32xbf16>,
    return
  }
}

</mosaic_0001>

<bundles_post_ra>
// kernel: tpu_custom_call.1
= control target key start
LH: loop header
LB: loop body
LE: loop exit
PB: predicated region body
PF: predicated region fallthrough
CT: control target
= control target key end

     0   :  { %8 = vsyncpa [#allocation3], 0  ;;  %s286_s0 = inlined_call_operand.hbm [shape: f32[2,8,32], index: 0, kind: input, shape index: {}]   ;;  %s287_s1 = inlined_call_operand.hbm [shape: bf16[32,32], index: 1, kind: input, shape index: {}]   ;;  %s288_s2 = inlined_call_operand.vmem [shape: f32[1,32], index: 2, kind: input, shape index: {}]   ;;  %s289_s3 = inlined_call_operand.hbm [shape: bf16[2,2,8,32], index: 3, kind: output, shape index: {}]  }
   0x1   :  { %9 = vsyncpa [#allocation6], 0 }
   0x2   :  { %10 = vsyncpa [#allocation4], 0  ;;  %s235_s12 = smov [#allocation2]  }
   0x3   :  { %s16_s13 = sshll.u32 %s235_s12, 4  ;;  %s17_s13 = int_to_ptr.vmem [resolvable:$true] %s16_s13 }
   0x4   :  { %s177_s14 = scalar_lea.vmem %s17_s13, 256  ;;  %p182_p1 = scmp.lt.s32.totalorder %s17_s13, %s17_s13 }
   0x5   :  { %p178_p0 = scmp.ne.s32.totalorder %s17_s13, %s177_s14  ;;  %p183_p2 = scmp.lt.s32.totalorder %s177_s14, %s177_s14 }
   0x7   :  { %p184_p3 = por %p183_p2, %p182_p1 }
   0x9   :  { %p185_p4 = pnand %p184_p3, %p178_p0 }
   0xb   :  { %188 = shalt.err (!%p185_p4)
}
   0xc   :  { %s236_s15 = smov 128   ;;  %s237_s16 = smov 8  }
   0xd   :  { %22 = dma.hbm_to_vmem [thread:$0]  %s286_s0, 256, %s17_s13, [#allocation3], %s236_s15, %s236_s15, %s237_s16  }
   0xe   :  { %s238_s19 = smov [#allocation5]  }
   0xf   :  { %s28_s20 = sshll.u32 %s238_s19, 4  ;;  %s29_s20 = int_to_ptr.vmem [resolvable:$true] %s28_s20 }
  0x10   :  { %s197_s21 = scalar_lea.vmem %s29_s20, 256  ;;  %p202_p6 = scmp.lt.s32.totalorder %s29_s20, %s29_s20 }
  0x11   :  { %p198_p5 = scmp.ne.s32.totalorder %s29_s20, %s197_s21  ;;  %p203_p7 = scmp.lt.s32.totalorder %s197_s21, %s197_s21 }
  0x13   :  { %p204_p8 = por %p203_p7, %p202_p6 }
  0x15   :  { %p205_p9 = pnand %p204_p8, %p198_p5 }
  0x17   :  { %208 = shalt.err (!%p205_p9)
}
  0x18   :  { %s239_s22 = smov 64   ;;  %s240_s23 = smov 4  }
  0x19   :  { %34 = dma.hbm_to_vmem [thread:$0]  %s287_s1, 256, %s29_s20, [#allocation6], %s239_s22, %s239_s22, %s240_s23  }
  0x1a   :  { %229 = dma.done.wait [#allocation3], 256  }
  0x1b   :  { %230 = vsyncadd [#allocation3], 4294967040 }
  0x1c   :  { %231 = dma.done.wait [#allocation6], 256  }
  0x1d   :  { %232 = vsyncadd [#allocation6], 4294967040  ;;  %v241_v0 = vmov 0.0   ;;  %vm242_vm0 = vmmov 0   ;;  %v167_v1 = vld [vmem:[#allocation5 + $0x8] sm:$0xff]   ;;  %v168_v2 = vld [vmem:[#allocation5] sm:$0xff]  }
  0x1e   :  { %150 = vmatprep.subr.bf16.mxu0 %v241_v0  ;;  %154 = vmatprep.mubr.msk.bf16.mxu0 %vm242_vm0, %v241_v0  ;;  %v44_v3 = vld [vmem:[#allocation2] sm:$0xff]  ;;  %v45_v4 = vld [vmem:[#allocation2 + $0x8] sm:$0xff]  ;;  %vm70_vm1 = vcmask 261120   ;;  %vm117_vm2 = vcmask 257024   ;;  %s243_s26 = smov [#allocation7]  }
  0x1f   :  { %151 = vmatpush3.bf16.msra.mxu0 %v167_v1  ;;  %v46_v5 = vpack.c.bf16 %v45_v4, %v44_v3  ;;  %v115_v6 = vpack.c.bf16 %v44_v3, %v44_v3  ;;  %v116_v7 = vpack.c.bf16 %v45_v4, %v45_v4  ;;  %v143_v8 = vld [vmem:[%s288_s2] ss:$0 sm:$0xff]  ;;  %s130_s27 = sshll.u32 %s243_s26, 4  ;;  %s131_s27 = int_to_ptr.vmem [resolvable:$true] %s130_s27 }
  0x20   :  { %152 = vmatprep.subr.bf16.mxu0 %v241_v0  ;;  %s209_s28 = scalar_lea.vmem %s131_s27, 256  ;;  %p214_p11 = scmp.lt.s32.totalorder %s131_s27, %s131_s27 }
  0x21   :  { %118 = vst.msk [vmem:[#allocation7] sm:$0xf] %vm117_vm2, %v115_v6  ;;  %119 = vst.msk [vmem:[#allocation7 + $0x4] sm:$0xf] %vm117_vm2, %v116_v7  ;;  %p210_p10 = scmp.ne.s32.totalorder %s131_s27, %s209_s28  ;;  %p215_p12 = scmp.lt.s32.totalorder %s209_s28, %s209_s28 }
  0x23   :  { %153 = vmatpush3.bf16.msra.mxu0 %v168_v2  ;;  %p216_p13 = por %p215_p12, %p214_p11 }
  0x25   :  { %p217_p0 = pnand %p216_p13, %p210_p10 }
  0x26   :  { %155 = vmatmul.mubr.msk.bf16.vlgmr.msra.gmra.mxu0 %vm70_vm1, %v46_v5 }
  0xe6   :  { %v108_v9 = vpop.f32.mrf.mxu0 }
  0xe7   :  { %v109_v10 = vadd.f32 %v143_v8, %v108_v9 }
  0xe8   :  { %v156_v11 = vpop.f32.mrf.mxu0 }
  0xe9   :  { %v120_v12 = vpack.c.bf16 %v109_v10, %v109_v10 }
  0xea   :  { %v111_v13 = vpop.f32.mrf.mxu0 }
  0xeb   :  { %123 = vst.msk [vmem:[#allocation7 + $0x8] sm:$0xf] %vm117_vm2, %v120_v12  ;;  %v112_v14 = vadd.f32 %v143_v8, %v111_v13 }
  0xec   :  { %v157_v15 = vpop.f32.mrf.mxu0 }
  0xed   :  { %v121_v16 = vpack.c.bf16 %v112_v14, %v112_v14 }
  0xef   :  { %124 = vst.msk [vmem:[#allocation7 + $0xc] sm:$0xf] %vm117_vm2, %v121_v16 }
  0xf0   :  { %220 = shalt.err (!%p217_p0)
}
  0xf1   :  { %136 = dma.vmem_to_hbm [thread:$0]  %s131_s27, 256, %s289_s3, [#allocation4], %s239_s22, %s239_s22, %s240_s23  }
  0xf2   :  { %233 = dma.done.wait [#allocation4], 256  }
  0xf3   :  { %234 = vsyncadd [#allocation4], 4294967040 }
  0xf4   :  { %140 = vsyncpa [#allocation3], 1 }
  0xf5   :  { %141 = vsyncpa [#allocation6], 1 }
  0xf6   :  { %142 = vsyncpa [#allocation4], 1 }

</bundles_post_ra>
